<compile_context>
chip_gen: v7x
topology: tpu7x:2x2x1
jax: 0.10.0
libtpu: 0.0.40
codegen_flags: <defaults>
</compile_context>

<pallas_src>
import math

import jax
import jax.numpy as jnp
from jax import lax
from jax.experimental import pallas as pl
from jax.experimental.pallas import tpu as pltpu

LANE = 128


def _sublane_quantum(dtype) -> int:
    """Sublane packing quantum: 8 rows for 4-byte, 16 for 2-byte, 32 for 1-byte."""
    item = jnp.dtype(dtype).itemsize
    return 8 * max(1, 4 // item)


def _vmem_limit_bytes() -> int:
    """Scoped-VMEM limit derived from this generation's physical capacity."""
    try:
        cap = int(pltpu.get_tpu_info().vmem_capacity_bytes)
    except Exception:  # query unavailable -> assume smallest (v7x: 64 MiB / TC)
        cap = 64 * 1024 * 1024
    # 3/4 of physical: 96 MiB on v5e/v6e (128 MiB), 48 MiB on v7x (64 MiB).
    return min((cap * 3) // 4, 96 * 1024 * 1024)


def _make_soft_dice_kernel(*, r_block, r_total, cpp, ragged):
    def kernel(probs_ref, targets_ref, pt_ref, pp_ref, tt_ref):
        # probs_ref: (N, r_block, LANE)   targets_ref: (r_block, LANE)
        # pt_ref / pp_ref: (N, LANE) f32  tt_ref: (1, LANE) f32
        k = pl.program_id(2)

        @pl.when(k == 0)
        def _init():
            pt_ref[...] = jnp.zeros_like(pt_ref)
            pp_ref[...] = jnp.zeros_like(pp_ref)
            tt_ref[...] = jnp.zeros_like(tt_ref)

        # In-vreg upcast (exact) + f32 accumulation == torch's `.float()`.
        p = probs_ref[...].astype(jnp.float32)      # (N, R, 128)
        t = targets_ref[...].astype(jnp.float32)    # (R, 128)

        def accumulate(p_m, t_m):
            # Sublane-only reductions; the cross-lane reduce happens in JAX.
            pt_ref[...] += jnp.sum(p_m * t_m[None, :, :], axis=1)         # (N, 128)
            pp_ref[...] += jnp.sum(p_m * p_m, axis=1)                     # (N, 128)
            tt_ref[...] += jnp.sum(t_m * t_m, axis=0, keepdims=True)      # (1, 128)

        if not ragged:
            accumulate(p, t)
        else:
            part = pl.program_id(1)
            # Rows of this chunk still inside the real spatial extent.
            valid = r_total - (part * cpp + k) * r_block

            @pl.when(valid >= r_block)          # full chunk: zero masking cost
            def _full():
                accumulate(p, t)

            @pl.when(valid < r_block)           # ragged tail / duplicated chunk
            def _tail():
                rows = lax.broadcasted_iota(jnp.int32, (r_block, LANE), 0)
                m = rows < valid
                accumulate(jnp.where(m[None, :, :], p, 0.0),
                           jnp.where(m, t, 0.0))

    return kernel


def soft_dice_loss(probs, targets, *, aggregate="mean", smooth=1e-06,
                   max_block_rows=None):
    """probs: (B, N, *spatial), targets: (B, *spatial). Matches SoftDiceLoss.forward."""
    assert aggregate in ("mean", "min", "max", None)
    B, N = int(probs.shape[0]), int(probs.shape[1])
    spatial_shape = tuple(probs.shape[2:])
    assert tuple(targets.shape) == (B,) + spatial_shape
    S = int(math.prod(spatial_shape))

    # `.float()` semantics: bf16/f16 stay native in HBM (upcast in-vreg is
    # exact); every other dtype is upcast to f32 here.
    def _prep(x):
        if x.dtype in (jnp.float32, jnp.bfloat16, jnp.float16):
            return x
        return x.astype(jnp.float32)

    probs = _prep(probs)
    targets = _prep(targets)

    probs_s = probs.reshape(B, N, S)
    targets_s = targets.reshape(B, S)

    # --- spatial -> (rows, 128) lanes --------------------------------------
    r_total = pl.cdiv(S, LANE)
    if S != r_total * LANE:
        # Rare fallback (non lane-aligned spatial size): pad to the next
        # multiple of 128.  Ragged *rows* never need padding — they are masked
        # in-kernel — so the common case incurs zero extra HBM traffic.
        pad = r_total * LANE - S
        probs_s = jnp.pad(probs_s, ((0, 0), (0, 0), (0, pad)))
        targets_s = jnp.pad(targets_s, ((0, 0), (0, pad)))
    probs_r = probs_s.reshape(B, N, r_total, LANE)
    targets_r = targets_s.reshape(B, r_total, LANE)

    # --- VMEM-aware tile sizing --------------------------------------------
    vmem_limit = _vmem_limit_bytes()
    p_item = jnp.dtype(probs.dtype).itemsize
    t_item = jnp.dtype(targets.dtype).itemsize
    quantum = max(_sublane_quantum(probs.dtype), _sublane_quantum(targets.dtype))
    # Per spatial row: double-buffered HBM-side inputs + ~3 f32 tile-sized
    # temporaries (upcast + products) live inside the kernel.
    row_bytes_in = LANE * (N * p_item + t_item)
    row_bytes_f32 = LANE * N * 4
    rows = int(vmem_limit * 0.75) // (2 * row_bytes_in + 3 * row_bytes_f32)
    rows = max(quantum, (rows // quantum) * quantum)
    if max_block_rows is not None:                       # test hook
        rows = min(rows, max(quantum, (int(max_block_rows) // quantum) * quantum))
    if (B % 2 == 1) and r_total >= 2 * quantum:
        # Guarantee >= 2 chunks so the chunk range can be split across both
        # v7x TensorCores when the batch axis alone cannot balance them.
        half = ((r_total + 1) // 2 + quantum - 1) // quantum * quantum
        rows = min(rows, half)

    if rows >= r_total:
        r_block, num_chunks = r_total, 1
    else:
        r_block, num_chunks = rows, pl.cdiv(r_total, rows)
    num_parts = 2 if num_chunks >= 2 else 1
    cpp = pl.cdiv(num_chunks, num_parts)                 # chunks per part
    ragged = (num_parts * cpp * r_block) != r_total
    needs_clamp = (num_parts * cpp) > num_chunks         # odd #chunks split in 2
    last_chunk = num_chunks - 1

    def chunk_index(part, k):
        c = part * cpp + k
        return jnp.minimum(c, last_chunk) if needs_clamp else c

    kernel = _make_soft_dice_kernel(r_block=r_block, r_total=r_total,
                                    cpp=cpp, ragged=ragged)

    pt_lane, pp_lane, tt_lane = pl.pallas_call(
        kernel,
        out_shape=(
            jax.ShapeDtypeStruct((B, num_parts, N, LANE), jnp.float32),  # sum p*t
            jax.ShapeDtypeStruct((B, num_parts, N, LANE), jnp.float32),  # sum p*p
            jax.ShapeDtypeStruct((B, num_parts, 1, LANE), jnp.float32),  # sum t*t
        ),
        grid_spec=pltpu.PrefetchScalarGridSpec(
            num_scalar_prefetch=0,
            grid=(B, num_parts, cpp),
            in_specs=[
                pl.BlockSpec((None, N, r_block, LANE),
                             lambda b, part, k: (b, 0, chunk_index(part, k), 0)),
                pl.BlockSpec((None, r_block, LANE),
                             lambda b, part, k: (b, chunk_index(part, k), 0)),
            ],
            out_specs=[
                pl.BlockSpec((None, None, N, LANE),
                             lambda b, part, k: (b, part, 0, 0)),
                pl.BlockSpec((None, None, N, LANE),
                             lambda b, part, k: (b, part, 0, 0)),
                pl.BlockSpec((None, None, 1, LANE),
                             lambda b, part, k: (b, part, 0, 0)),
            ],
        ),
        compiler_params=pltpu.CompilerParams(
            dimension_semantics=("parallel", "parallel", "arbitrary"),
            vmem_limit_bytes=int(vmem_limit),
        ),
    )(probs_r, targets_r)

    # Tiny cross-lane / cross-part reduce + dice / aggregate in plain JAX.
    pt = jnp.sum(pt_lane, axis=(1, 3))                   # (B, N)
    pp = jnp.sum(pp_lane, axis=(1, 3))                   # (B, N)
    tt = jnp.sum(tt_lane, axis=(1, 3))                   # (B, 1)
    dice = (2.0 * pt + smooth) / (pp + tt + smooth)      # (B, N); torch's is (N, B)

    if aggregate is None:
        return 1.0 - dice.T                              # (N, B), matches torch
    if aggregate == "max":
        dice_best = jnp.max(dice, axis=1)
    elif aggregate == "min":
        dice_best = jnp.min(dice, axis=1)
    else:
        dice_best = jnp.mean(dice, axis=1)
    return 1.0 - jnp.mean(dice_best)


def _reference_soft_dice_loss(probs, targets, *, aggregate="mean", smooth=1e-06):
    """Pure-JAX mirror of the PyTorch forward."""
    probs = probs.astype(jnp.float32)
    targets = targets.astype(jnp.float32)
    perm = (1, 0) + tuple(range(2, probs.ndim))
    p = jnp.transpose(probs, perm)                        # (N, B, *spatial)
    t = jnp.broadcast_to(targets[None], p.shape)
    spatial_dims = tuple(range(2, p.ndim))
    num = 2.0 * jnp.sum(p * t, axis=spatial_dims)
    den = jnp.sum(p * p, axis=spatial_dims) + jnp.sum(t * t, axis=spatial_dims)
    dice = (num + smooth) / (den + smooth)                # (N, B)
    if aggregate is None:
        return 1.0 - dice
    if aggregate == "max":
        dice_best = jnp.max(dice, axis=0)
    elif aggregate == "min":
        dice_best = jnp.min(dice, axis=0)
    else:
        dice_best = jnp.mean(dice, axis=0)
    return 1.0 - jnp.mean(dice_best)


if __name__ == "__main__":
    key = jax.random.PRNGKey(0)
    kp, kt, kp2, kt2, kp3, kt3 = jax.random.split(key, 6)

    # --- 4-D case, f32, default aggregate='mean' (single lane-aligned chunk) ---
    B, N, H, W = 2, 4, 16, 16
    probs = jax.nn.softmax(
        jax.random.normal(kp, (B, N, H, W), dtype=jnp.float32), axis=1)
    targets = (jax.random.uniform(kt, (B, H, W)) > 0.5).astype(jnp.float32)
    loss = jax.block_until_ready(soft_dice_loss(probs, targets))
    ref = _reference_soft_dice_loss(probs, targets)
    assert jnp.allclose(loss, ref, rtol=1e-5, atol=1e-6), (loss, ref)

    # --- bf16 inputs stay native in HBM; in-vreg upcast, f32 accumulation ---
    loss_bf = jax.block_until_ready(
        soft_dice_loss(probs.astype(jnp.bfloat16), targets.astype(jnp.bfloat16)))
    ref_bf = _reference_soft_dice_loss(
        probs.astype(jnp.bfloat16).astype(jnp.float32),
        targets.astype(jnp.bfloat16).astype(jnp.float32))
    assert jnp.allclose(loss_bf, ref_bf, rtol=1e-4, atol=1e-5), (loss_bf, ref_bf)

    # --- 5-D case, aggregate=None, forced small block to exercise the
    #     multi-chunk / chunk-range-split / ragged-tail masked path (B=1, odd) ---
    B2, N2 = 1, 3
    sp = (8, 16, 19)                                   # S = 2432 = 19 * 128 rows
    probs5 = jax.nn.softmax(
        jax.random.normal(kp2, (B2, N2) + sp, dtype=jnp.float32), axis=1)
    targets5 = (jax.random.uniform(kt2, (B2,) + sp) > 0.5).astype(jnp.float32)
    out5 = jax.block_until_ready(
        soft_dice_loss(probs5, targets5, aggregate=None, max_block_rows=8))
    ref5 = _reference_soft_dice_loss(probs5, targets5, aggregate=None)
    assert out5.shape == (N2, B2)
    assert jnp.allclose(out5, ref5, rtol=1e-5, atol=1e-6), (out5, ref5)

    # --- non lane-aligned spatial size (pad fallback), int targets, 'min' ---
    B3, N3 = 2, 4
    sp3 = (5, 7)                                       # S = 35
    probs3 = jax.nn.softmax(
        jax.random.normal(kp3, (B3, N3) + sp3, dtype=jnp.float32), axis=1)
    targets3 = (jax.random.uniform(kt3, (B3,) + sp3) > 0.5).astype(jnp.int32)
    loss3 = jax.block_until_ready(soft_dice_loss(probs3, targets3, aggregate="min"))
    ref3 = _reference_soft_dice_loss(probs3, targets3, aggregate="min")
    assert jnp.allclose(loss3, ref3, rtol=1e-5, atol=1e-6), (loss3, ref3)

    print("KERNEL_OK")
</pallas_src>

<mosaic_0001>
module attributes {stable_mosaic.version = 11 : i64} {
  func.func @kernel(%arg0: i32, %arg1: i32, %arg2: i32, %arg3: memref<1x4x2x128xf32, #tpu.memory_space<vmem>>, %arg4: memref<1x2x128xf32, #tpu.memory_space<vmem>>, %arg5: memref<1x1x4x128xf32, #tpu.memory_space<vmem>>, %arg6: memref<1x1x4x128xf32, #tpu.memory_space<vmem>>, %arg7: memref<1x1x1x128xf32, #tpu.memory_space<vmem>>) attributes {dimension_semantics = [#tpu.dimension_semantics<parallel>, #tpu.dimension_semantics<parallel>, #tpu.dimension_semantics<arbitrary>], iteration_bounds = array<i64: 2, 1, 1>, scalar_prefetch = 0 : i64, scratch_operands = 0 : i64, tpu.core_type = #tpu.core_type<tc>, window_params = [{transform_indices = @transform_0, window_bounds = array<i64: 1, 4, 2, 128>}, {transform_indices = @transform_1, window_bounds = array<i64: 1, 2, 128>}, {transform_indices = @transform_2, window_bounds = array<i64: 1, 1, 4, 128>}, {transform_indices = @transform_3, window_bounds = array<i64: 1, 1, 4, 128>}, {transform_indices = @transform_4, window_bounds = array<i64: 1, 1, 1, 128>}]} {
    %c0_i32 = arith.constant 0 : i32
    %0 = arith.cmpi eq, %arg2, %c0_i32 : i32
    %1 = arith.extui %0 : i1 to i32
    %c0_i32_0 = arith.constant 0 : i32
    %2 = arith.cmpi ne, %1, %c0_i32_0 : i32
    scf.if %2 {
      %cst_33 = arith.constant 0.000000e+00 : f32
      %34 = vector.broadcast %cst_33 : f32 to vector<4x128xf32>
      %c0_34 = arith.constant 0 : index
      %c0_35 = arith.constant 0 : index
      %c0_36 = arith.constant 0 : index
      %c0_37 = arith.constant 0 : index
      %35 = vector.load %arg5[%c0_34, %c0_35, %c0_36, %c0_37] : memref<1x1x4x128xf32, #tpu.memory_space<vmem>>, vector<1x1x4x128xf32>
      %36 = vector.shape_cast %35 : vector<1x1x4x128xf32> to vector<4x128xf32>
      %37 = vector.shape_cast %34 : vector<4x128xf32> to vector<1x1x4x128xf32>
      tpu.vector_store %arg5[%c0_34, %c0_35, %c0_36, %c0_37], %37 {strides = array<i32>} : memref<1x1x4x128xf32, #tpu.memory_space<vmem>>, vector<1x1x4x128xf32>,
      %cst_38 = arith.constant 0.000000e+00 : f32
      %38 = vector.broadcast %cst_38 : f32 to vector<4x128xf32>
      %c0_39 = arith.constant 0 : index
      %c0_40 = arith.constant 0 : index
      %c0_41 = arith.constant 0 : index
      %c0_42 = arith.constant 0 : index
      %39 = vector.load %arg6[%c0_39, %c0_40, %c0_41, %c0_42] : memref<1x1x4x128xf32, #tpu.memory_space<vmem>>, vector<1x1x4x128xf32>
      %40 = vector.shape_cast %39 : vector<1x1x4x128xf32> to vector<4x128xf32>
      %41 = vector.shape_cast %38 : vector<4x128xf32> to vector<1x1x4x128xf32>
      tpu.vector_store %arg6[%c0_39, %c0_40, %c0_41, %c0_42], %41 {strides = array<i32>} : memref<1x1x4x128xf32, #tpu.memory_space<vmem>>, vector<1x1x4x128xf32>,
      %cst_43 = arith.constant 0.000000e+00 : f32
      %42 = vector.broadcast %cst_43 : f32 to vector<1x128xf32>
      %c0_44 = arith.constant 0 : index
      %c0_45 = arith.constant 0 : index
      %c0_46 = arith.constant 0 : index
      %c0_47 = arith.constant 0 : index
      %43 = vector.load %arg7[%c0_44, %c0_45, %c0_46, %c0_47] : memref<1x1x1x128xf32, #tpu.memory_space<vmem>>, vector<1x1x1x128xf32>
      %44 = vector.shape_cast %43 : vector<1x1x1x128xf32> to vector<1x128xf32>
      %45 = vector.shape_cast %42 : vector<1x128xf32> to vector<1x1x1x128xf32>
      tpu.vector_store %arg7[%c0_44, %c0_45, %c0_46, %c0_47], %45 {strides = array<i32>} : memref<1x1x1x128xf32, #tpu.memory_space<vmem>>, vector<1x1x1x128xf32>,
    } else {
    }
    %c0 = arith.constant 0 : index
    %c0_1 = arith.constant 0 : index
    %c0_2 = arith.constant 0 : index
    %c0_3 = arith.constant 0 : index
    %3 = vector.load %arg3[%c0, %c0_1, %c0_2, %c0_3] : memref<1x4x2x128xf32, #tpu.memory_space<vmem>>, vector<1x4x2x128xf32>
    %4 = vector.shape_cast %3 : vector<1x4x2x128xf32> to vector<4x2x128xf32>
    %c0_4 = arith.constant 0 : index
    %c0_5 = arith.constant 0 : index
    %c0_6 = arith.constant 0 : index
    %5 = vector.load %arg4[%c0_4, %c0_5, %c0_6] : memref<1x2x128xf32, #tpu.memory_space<vmem>>, vector<1x2x128xf32>
    %6 = vector.shape_cast %5 : vector<1x2x128xf32> to vector<2x128xf32>
    %c0_7 = arith.constant 0 : index
    %c0_8 = arith.constant 0 : index
    %c0_9 = arith.constant 0 : index
    %c0_10 = arith.constant 0 : index
    %7 = vector.load %arg5[%c0_7, %c0_8, %c0_9, %c0_10] : memref<1x1x4x128xf32, #tpu.memory_space<vmem>>, vector<1x1x4x128xf32>
    %8 = vector.shape_cast %7 : vector<1x1x4x128xf32> to vector<4x128xf32>
    %9 = vector.shape_cast %6 : vector<2x128xf32> to vector<1x2x128xf32>
    %10 = vector.broadcast %9 : vector<1x2x128xf32> to vector<4x2x128xf32>
    %11 = arith.mulf %4, %10 : vector<4x2x128xf32>
    %cst = arith.constant dense<0.000000e+00> : vector<4x128xf32>
    %12 = vector.multi_reduction <add>, %11, %cst [1] : vector<4x2x128xf32> to vector<4x128xf32>
    %13 = arith.addf %8, %12 : vector<4x128xf32>
    %c0_11 = arith.constant 0 : index
    %c0_12 = arith.constant 0 : index
    %c0_13 = arith.constant 0 : index
    %c0_14 = arith.constant 0 : index
    %14 = vector.load %arg5[%c0_11, %c0_12, %c0_13, %c0_14] : memref<1x1x4x128xf32, #tpu.memory_space<vmem>>, vector<1x1x4x128xf32>
    %15 = vector.shape_cast %14 : vector<1x1x4x128xf32> to vector<4x128xf32>
    %16 = vector.shape_cast %13 : vector<4x128xf32> to vector<1x1x4x128xf32>
    tpu.vector_store %arg5[%c0_11, %c0_12, %c0_13, %c0_14], %16 {strides = array<i32>} : memref<1x1x4x128xf32, #tpu.memory_space<vmem>>, vector<1x1x4x128xf32>,
    %c0_15 = arith.constant 0 : index
    %c0_16 = arith.constant 0 : index
    %c0_17 = arith.constant 0 : index
    %c0_18 = arith.constant 0 : index
    %17 = vector.load %arg6[%c0_15, %c0_16, %c0_17, %c0_18] : memref<1x1x4x128xf32, #tpu.memory_space<vmem>>, vector<1x1x4x128xf32>
    %18 = vector.shape_cast %17 : vector<1x1x4x128xf32> to vector<4x128xf32>
    %19 = arith.mulf %4, %4 : vector<4x2x128xf32>
    %cst_19 = arith.constant dense<0.000000e+00> : vector<4x128xf32>
    %20 = vector.multi_reduction <add>, %19, %cst_19 [1] : vector<4x2x128xf32> to vector<4x128xf32>
    %21 = arith.addf %18, %20 : vector<4x128xf32>
    %c0_20 = arith.constant 0 : index
    %c0_21 = arith.constant 0 : index
    %c0_22 = arith.constant 0 : index
    %c0_23 = arith.constant 0 : index
    %22 = vector.load %arg6[%c0_20, %c0_21, %c0_22, %c0_23] : memref<1x1x4x128xf32, #tpu.memory_space<vmem>>, vector<1x1x4x128xf32>
    %23 = vector.shape_cast %22 : vector<1x1x4x128xf32> to vector<4x128xf32>
    %24 = vector.shape_cast %21 : vector<4x128xf32> to vector<1x1x4x128xf32>
    tpu.vector_store %arg6[%c0_20, %c0_21, %c0_22, %c0_23], %24 {strides = array<i32>} : memref<1x1x4x128xf32, #tpu.memory_space<vmem>>, vector<1x1x4x128xf32>,
    %c0_24 = arith.constant 0 : index
    %c0_25 = arith.constant 0 : index
    %c0_26 = arith.constant 0 : index
    %c0_27 = arith.constant 0 : index
    %25 = vector.load %arg7[%c0_24, %c0_25, %c0_26, %c0_27] : memref<1x1x1x128xf32, #tpu.memory_space<vmem>>, vector<1x1x1x128xf32>
    %26 = vector.shape_cast %25 : vector<1x1x1x128xf32> to vector<1x128xf32>
    %27 = arith.mulf %6, %6 : vector<2x128xf32>
    %cst_28 = arith.constant dense<0.000000e+00> : vector<128xf32>
    %28 = vector.multi_reduction <add>, %27, %cst_28 [0] : vector<2x128xf32> to vector<128xf32>
    %29 = vector.shape_cast %28 : vector<128xf32> to vector<1x128xf32>
    %30 = arith.addf %26, %29 : vector<1x128xf32>
    %c0_29 = arith.constant 0 : index
    %c0_30 = arith.constant 0 : index
    %c0_31 = arith.constant 0 : index
    %c0_32 = arith.constant 0 : index
    %31 = vector.load %arg7[%c0_29, %c0_30, %c0_31, %c0_32] : memref<1x1x1x128xf32, #tpu.memory_space<vmem>>, vector<1x1x1x128xf32>
    %32 = vector.shape_cast %31 : vector<1x1x1x128xf32> to vector<1x128xf32>
    %33 = vector.shape_cast %30 : vector<1x128xf32> to vector<1x1x1x128xf32>
    tpu.vector_store %arg7[%c0_29, %c0_30, %c0_31, %c0_32], %33 {strides = array<i32>} : memref<1x1x1x128xf32, #tpu.memory_space<vmem>>, vector<1x1x1x128xf32>,
    return
  }
  func.func @transform_0(%arg0: i32, %arg1: i32, %arg2: i32) -> (i32, i32, i32, i32) {
    %c1_i32 = arith.constant 1 : i32
    %0 = arith.muli %arg1, %c1_i32 : i32
    %1 = arith.addi %0, %arg2 : i32
    %c0_i32 = arith.constant 0 : i32
    %c0_i32_0 = arith.constant 0 : i32
    %c0_i32_1 = arith.constant 0 : i32
    return %arg0, %c0_i32, %1, %c0_i32_0 : i32, i32, i32, i32
  }
  func.func @transform_1(%arg0: i32, %arg1: i32, %arg2: i32) -> (i32, i32, i32) {
    %c1_i32 = arith.constant 1 : i32
    %0 = arith.muli %arg1, %c1_i32 : i32
    %1 = arith.addi %0, %arg2 : i32
    %c0_i32 = arith.constant 0 : i32
    %c0_i32_0 = arith.constant 0 : i32
    return %arg0, %1, %c0_i32 : i32, i32, i32
  }
  func.func @transform_2(%arg0: i32, %arg1: i32, %arg2: i32) -> (i32, i32, i32, i32) {
    %c0_i32 = arith.constant 0 : i32
    %c0_i32_0 = arith.constant 0 : i32
    %c0_i32_1 = arith.constant 0 : i32
    return %arg0, %arg1, %c0_i32, %c0_i32_0 : i32, i32, i32, i32
  }
  func.func @transform_3(%arg0: i32, %arg1: i32, %arg2: i32) -> (i32, i32, i32, i32) {
    %c0_i32 = arith.constant 0 : i32
    %c0_i32_0 = arith.constant 0 : i32
    %c0_i32_1 = arith.constant 0 : i32
    return %arg0, %arg1, %c0_i32, %c0_i32_0 : i32, i32, i32, i32
  }
  func.func @transform_4(%arg0: i32, %arg1: i32, %arg2: i32) -> (i32, i32, i32, i32) {
    %c0_i32 = arith.constant 0 : i32
    %c0_i32_0 = arith.constant 0 : i32
    %c0_i32_1 = arith.constant 0 : i32
    return %arg0, %arg1, %c0_i32, %c0_i32_0 : i32, i32, i32, i32
  }
}

</mosaic_0001>

<bundles_post_ra>
// kernel: tpu_custom_call.1
= control target key start
LH: loop header
LB: loop body
LE: loop exit
PB: predicated region body
PF: predicated region fallthrough
CT: control target
= control target key end

     0   :  { %s1307_s0 = inlined_call_operand.hbm [shape: f32[2,4,2,128], index: 0, kind: input, shape index: {}]   ;;  %s1308_s1 = inlined_call_operand.hbm [shape: f32[2,2,128], index: 1, kind: input, shape index: {}]   ;;  %s1309_s2 = inlined_call_operand.hbm [shape: f32[2,1,4,128], index: 2, kind: output, shape index: {0}]   ;;  %s1310_s3 = inlined_call_operand.hbm [shape: f32[2,1,4,128], index: 3, kind: output, shape index: {1}]   ;;  %s1311_s4 = inlined_call_operand.hbm [shape: f32[2,1,1,128], index: 4, kind: output, shape index: {2}]  }
   0x1   :  { %1315 = sst [smem:[#allocation15_spill]] %s1307_s0 }
   0x2   :  { %10 = vsyncpa [#allocation3], 0 }
   0x3   :  { %12 = vsyncpa [#allocation3 + $0x1], 0 }
   0x4   :  { %13 = vsyncpa [#allocation6], 0 }
   0x5   :  { %15 = vsyncpa [#allocation6 + $0x1], 0 }
   0x6   :  { %16 = vsyncpa [#allocation4], 0 }
   0x7   :  { %18 = vsyncpa [#allocation4 + $0x1], 0 }
   0x8   :  { %19 = vsyncpa [#allocation9], 0 }
   0x9   :  { %21 = vsyncpa [#allocation9 + $0x1], 0  ;;  %s986_s15 = smov 0   ;;  %s988_s16 = smov 0  }
   0xa   :  { %s990_s17 = smov 0   ;;  %s992_s18 = smov 0  }
   0xb   :  { %s994_s19 = smov 0   ;;  %s996_s20 = smov 0  }
   0xc LB: > { %s1017_s21 = sadd.s32 4294967295, %s951_s20   ;;  %s1313_s22 = sadd.s32 4294967294, %s951_s20   ;;  %s951_s20 = sphi %s996_s20, %s27_s20   ;;  %s947_s19 = sphi %s994_s19, %s1334_s19   ;;  %s943_s18 = sphi %s992_s18, %s1333_s18   ;;  %s939_s17 = sphi %s990_s17, %s1332_s17   ;;  %s935_s16 = sphi %s988_s16, %s1331_s16   ;;  %s931_s15 = sphi %s986_s15, %s1330_s15  }
   0xd   : > { %s46_s23 = sadd.s32 1, %s947_s19  ;;  %s57_s24 = sadd.s32 1, %s939_s17 }
   0xe   : > { %p48_p0 = scmp.ge.s32.totalorder %s46_s23, 2  ;;  %p64_p1 = scmp.ne.s32.totalorder %s939_s17, %s935_s16 }
   0xf   : > { %p65_p2 = scmp.eq.s32.totalorder %s951_s20, 0  ;;  %p70_p3 = scmp.ne.s32.totalorder %s935_s16, %s931_s15 }
  0x10   : > { %s1336_s23 = smov (%p48_p0, %s46_s23), 0  ;;  %p71_p5 = scmp.eq.s32.totalorder %s1017_s21, 0 }
  0x11   : > { %p1029_p4 = por %p65_p2, %p64_p1  ;;  %s52_s26 = ssub.s32 %s947_s19, %s1336_s23 }
  0x12   : > { %p126_p6 = scmp.eq.s32.totalorder %s1017_s21, 1  ;;  %p55_p7 = scmp.eq.s32.totalorder %s52_s26, 0 }
  0x13   : > { %p1037_p8 = por %p71_p5, %p70_p3  ;;  %p132_p10 = scmp.eq.s32.totalorder %s1313_s22, 1 }
  0x14   : > { %p1041_p9 = por %p126_p6, %p64_p1  ;;  %p692_p13 = scmp.lt.s32.totalorder %s951_s20, 2 }
  0x15   : > { %s1317_s27 = scalar_select %p1037_p8, 1, 0 }
  0x16   : > { %s1318_s28 = scalar_select %p1041_p9, 1, 0 }
  0x17   : > { %s1048_s29 = scalar_select %p55_p7, %s939_s17, %s57_s24  }
  0x18   : > { %p1050_p11 = por %p132_p10, %p70_p3  ;;  %s1057_s5 = sand.u32 1, %s939_s17  }
  0x19   : > { %s647_s6 = sshll.u32 %s1057_s5, 3  ;;  %s664_s7 = sshll.u32 %s947_s19, 7 }
  0x1a   : > { %s1319_s30 = scalar_select %p1050_p11, 1, 0 }
  0x1b   : > { %s1320_s0 = sld [smem:[#allocation15_spill]]  ;;  %s212_s11 = scalar_lea.vmem [#allocation2], %s647_s6 }
  0x1c   : > { %s221_s12 = sshll.u32 %s212_s11, 4  ;;  %p1070_p0 = pnand %p692_p13, %p1029_p4  ;;  %s1066_s12 = int_to_ptr.vmem [resolvable:$true] %s221_s12 }
  0x1d   : > { %s209_s14 = scalar_lea.sflag [#allocation3], %s1057_s5 }
  0x1e   : > { %p747_p3 = pneg %p1070_p0 }
  0x21   : > { %s1064_s10 = scalar_lea.hbm %s1320_s0, %s664_s7  ;;  %s750_s25 = scalar_lea.hbm %s1320_s0, 256 }
  0x22   : > { %s745_s24 = scalar_lea.hbm %s1064_s10, 128  ;;  %p751_p4 = scmp.lt.u32.totalorder %s1064_s10, %s1320_s0 }
  0x23   : > { %p746_p2 = scmp.ne.s32.totalorder %s1064_s10, %s745_s24  ;;  %p752_p7 = scmp.lt.u32.totalorder %s750_s25, %s745_s24 }
  0x24   : > { %p754_p13 = scmp.lt.u32.totalorder %s745_s24, %s1064_s10 }
  0x25   : > { %p748_p5 = pnand %p747_p3, %p746_p2  ;;  %p753_p10 = por %p752_p7, %p751_p4 }
  0x27   : > { %p749_p6 = pneg %p748_p5  ;;  %p755_p12 = por %p754_p13, %p753_p10 }
  0x29   : > { %p756_p1 = pnand %p755_p12, %p749_p6 }
  0x2b   : > { %759 = shalt.err (!%p756_p1)
}
  0x2c   : > { %s760_s9 = scalar_lea.vmem %s1066_s12, 128  ;;  %s953_s11 = smov [#allocation2]  }
  0x2d   : > { %p761_p2 = scmp.ne.s32.totalorder %s1066_s12, %s760_s9  ;;  %s765_s26 = sshll.u32 %s953_s11, 4  ;;  %s766_s26 = int_to_ptr.vmem [resolvable:$false] %s765_s26 }
  0x2e   : > { %s767_s6 = scalar_lea.vmem %s766_s26, 256  ;;  %p768_p9 = scmp.lt.s32.totalorder %s1066_s12, %s766_s26 }
  0x2f   : > { %p763_p5 = pnand %p761_p2, %p747_p3  ;;  %p769_p4 = scmp.lt.s32.totalorder %s767_s6, %s760_s9 }
  0x31   : > { %p764_p11 = pneg %p763_p5  ;;  %p770_p7 = por %p769_p4, %p768_p9 }
  0x33   : > { %p771_p10 = pnand %p770_p7, %p764_p11 }
  0x35   : > { %774 = shalt.err (!%p771_p10)
}
  0x36   : > { %s954_s24 = smov 32   ;;  %s955_s25 = smov 2  }
  0x37   : > { %678 = dma.hbm_to_vmem [thread:$0]  (!%p1070_p0), %s1064_s10, 128, %s1066_s12, %s209_s14, %s954_s24, %s954_s24, %s955_s25  }
  0x38   : > { %p249_p12 = scmp.lt.s32.totalorder %s951_s20, 3  ;;  %s650_s7 = sshll.u32 %s1057_s5, 1 }
  0x39   : > { %s651_s8 = sshll.u32 %s947_s19, 5  ;;  %p1322_p9 = scmp.ge.s32.totalorder %s951_s20, 1 }
  0x3a   : > { %s1115_s6 = scalar_lea.hbm %s1308_s1, %s651_s8  ;;  %s235_s22 = scalar_lea.vmem [#allocation5], %s650_s7 }
  0x3b   : > { %p1108_p11 = pnand %p1322_p9, %p249_p12  ;;  %s244_s0 = sshll.u32 %s235_s22, 4  ;;  %s245_s0 = int_to_ptr.vmem [resolvable:$true] %s244_s0 }
  0x3c   : > { %s232_s10 = scalar_lea.sflag [#allocation6], %s1057_s5  ;;  %s775_s12 = scalar_lea.hbm %s1115_s6, 32 }
  0x3d   : > { %s1323_s9 = scalar_select %p1108_p11, 1, 0 }
  0x3e   : > { %p776_p1 = scmp.ne.s32.totalorder %s1115_s6, %s775_s12  ;;  %s780_s25 = scalar_lea.hbm %s1308_s1, 64 }
  0x3f   : > { %p781_p2 = scmp.lt.u32.totalorder %s1115_s6, %s1308_s1  ;;  %p782_p5 = scmp.lt.u32.totalorder %s780_s25, %s775_s12 }
  0x40   : > { %p778_p6 = pnand %p776_p1, %p747_p3  ;;  %p784_p7 = scmp.lt.u32.totalorder %s775_s12, %s1115_s6 }
  0x41   : > { %p783_p4 = por %p782_p5, %p781_p2 }
  0x42   : > { %p779_p13 = pneg %p778_p6 }
  0x43   : > { %p785_p10 = por %p784_p7, %p783_p4 }
  0x45   : > { %p786_p12 = pnand %p785_p10, %p779_p13 }
  0x47   : > { %789 = shalt.err (!%p786_p12)
}
  0x48   : > { %s790_s22 = scalar_lea.vmem %s245_s0, 32  ;;  %s956_s5 = smov [#allocation5]  }
  0x49   : > { %p791_p9 = scmp.ne.s32.totalorder %s245_s0, %s790_s22  ;;  %s795_s7 = sshll.u32 %s956_s5, 4  ;;  %s796_s7 = int_to_ptr.vmem [resolvable:$false] %s795_s7 }
  0x4a   : > { %s797_s26 = scalar_lea.vmem %s796_s7, 64  ;;  %p798_p8 = scmp.lt.s32.totalorder %s245_s0, %s796_s7 }
  0x4b   : > { %p793_p1 = pnand %p791_p9, %p747_p3  ;;  %p799_p11 = scmp.lt.s32.totalorder %s797_s26, %s790_s22 }
  0x4d   : > { %p794_p6 = pneg %p793_p1  ;;  %p800_p2 = por %p799_p11, %p798_p8 }
  0x4f   : > { %p801_p5 = pnand %p800_p2, %p794_p6 }
  0x51   : > { %804 = shalt.err (!%p801_p5)
}
  0x52   : > { %681 = dma.hbm_to_vmem [thread:$0]  (!%p1070_p0), %s1115_s6, 32, %s245_s0, %s232_s10  }
  0x53   : > { %p1324_p13 = scmp.ne.s32.totalorder %s1323_s9, 0 }
  0x54   : > { %s1140_s12 = sand.u32 (!%p1324_p13), 1, %s935_s16   ;;  %p1325_p3 = scmp.ne.s32.totalorder (!%p1324_p13), %s1317_s27, 0 }
  0x55   : > { %253 = sbr.rel (%p1324_p13) target bundleno = 187 (0xbb), region = 28  ;;  %s653_s14 = sshll.u32 (!%p1324_p13), %s1140_s12, 3 }
  0x56   : > { %s256_s24 = scalar_lea.sflag (!%p1324_p13), [#allocation3], %s1140_s12  ;;  %s259_s25 = scalar_lea.vmem (!%p1324_p13), [#allocation2], %s653_s14 }
  0x5c   : > { %914 = dma.done.wait (%p1325_p3), %s256_s24, 128  }
  0x5d   : > { %916 = vsyncadd (%p1325_p3), %s256_s24, 4294967168  ;;  %s654_s0 = sshll.u32 %s1140_s12, 1  ;;  %s265_s13 = scalar_lea.sflag [#allocation6], %s1140_s12 }
  0x5e   : > { %s268_s9 = scalar_lea.vmem [#allocation5], %s654_s0 }
  0x5f   : > { %918 = dma.done.wait (%p1325_p3), %s265_s13, 32  }
  0x60   : > { %920 = vsyncadd (%p1325_p3), %s265_s13, 4294967264  ;;  %s655_s6 = sshll.u32 %s1140_s12, 2  ;;  %s1156_s10 = scalar_lea.vmem [#allocation10], %s1140_s12  ;;  %v957_v0 = vmov 0.0   ;;  %vm326_vm0 = vcmask 1041408   ;;  %vm359_vm1 = vcmask 1041409  }
  0x61   : > { %315 = vst [vmem:[%s1156_s10] sm:$0x1] %v957_v0  ;;  %s1159_s8 = scalar_lea.vmem [#allocation8], %s655_s6  ;;  %s1162_s11 = scalar_lea.vmem [#allocation7], %s655_s6  ;;  %v316_v1 = vld [vmem:[%s259_s25] sm:$0x3]  ;;  %vm361_vm2 = vcmask 1042434  }
  0x62   : > { %314 = vst [vmem:[%s1159_s8] sm:$0xf] %v957_v0  ;;  %313 = vst [vmem:[%s1162_s11] sm:$0xf] %v957_v0  ;;  %v317_v2 = vld [vmem:[%s259_s25 + $0x2] sm:$0x3]  ;;  %v318_v3 = vld [vmem:[%s259_s25 + $0x4] sm:$0x3]  ;;  %v369_v5 = vmul.f32 %v316_v1, %v316_v1 }
  0x63   : > { %v319_v4 = vld [vmem:[%s259_s25 + $0x6] sm:$0x3]  ;;  %v370_v6 = vmul.f32 %v317_v2, %v317_v2  ;;  %v371_v7 = vmul.f32 %v318_v3, %v318_v3  ;;  %v1165_v8 = vld [vmem:[%s268_s9] sm:$0x3]  ;;  %vm363_vm3 = vcmask 1043459   ;;  %s427_s27 = sand.u32 1, %s1017_s21  }
  0x64   : > { %v372_v9 = vmul.f32 %v319_v4, %v319_v4  ;;  %v322_v10 = vmul.f32 %v1165_v8, %v316_v1  ;;  %v323_v11 = vmul.f32 %v1165_v8, %v317_v2  ;;  %v324_v12 = vmul.f32 %v1165_v8, %v318_v3  ;;  %s659_s22 = sshll.u32 %s943_s18, 6  ;;  %s460_s5 = sshll.u32 %s1159_s8, 4  ;;  %s1197_s5 = int_to_ptr.vmem [resolvable:$true] %s460_s5 }
  0x65   : > { %v373_v13 = vsel %vm326_vm0, %v369_v5, 0.0  ;;  %v380_v14 = vsel %vm326_vm0, %v370_v6, 0.0  ;;  %v387_v15 = vsel %vm326_vm0, %v371_v7, 0.0  ;;  %v325_v16 = vmul.f32 %v1165_v8, %v319_v4  ;;  %s446_s21 = sshll.u32 %s1162_s11, 4  ;;  %s1195_s14 = scalar_lea.hbm %s1310_s3, %s659_s22  ;;  %s1207_s21 = int_to_ptr.vmem [resolvable:$true] %s446_s21 }
  0x66   : > { %v374_v17 = vrot.slane %v373_v13, 4  ;;  %v381_v18 = vrot.slane %v380_v14, 4  ;;  %v388_v19 = vrot.slane %v387_v15, 4  ;;  %v394_v20 = vsel %vm326_vm0, %v372_v9, 0.0  ;;  %s1205_s0 = scalar_lea.hbm %s1309_s2, %s659_s22  ;;  %s1209_s13 = scalar_lea.sflag [#allocation9], %s427_s27 }
  0x67   : > { %v395_v21 = vrot.slane %v394_v20, 4  ;;  %v327_v22 = vsel %vm326_vm0, %v322_v10, 0.0  ;;  %v334_v23 = vsel %vm326_vm0, %v323_v11, 0.0  ;;  %v341_v24 = vsel %vm326_vm0, %v324_v12, 0.0  ;;  %s805_s9 = scalar_lea.vmem %s1197_s5, 64  ;;  %p1326_p0 = scmp.ne.s32.totalorder %s1318_s28, 0 }
  0x68   : > { %v375_v25 = vadd.f32 %v374_v17, %v373_v13  ;;  %v382_v26 = vadd.f32 %v381_v18, %v380_v14  ;;  %v389_v27 = vadd.f32 %v388_v19, %v387_v15  ;;  %v328_v28 = vrot.slane %v327_v22, 4  ;;  %p806_p8 = scmp.ne.s32.totalorder %s1197_s5, %s805_s9  ;;  %s958_s6 = smov [#allocation8]  }
  0x69   : > { %v396_v29 = vadd.f32 %v395_v21, %v394_v20  ;;  %v335_v30 = vrot.slane %v334_v23, 4  ;;  %v342_v31 = vrot.slane %v341_v24, 4  ;;  %v348_v32 = vsel %vm326_vm0, %v325_v16, 0.0  ;;  %v368_v1 = vld [vmem:[%s1159_s8] sm:$0xf] }
  0x6a   : > { %v376_v33 = vrot.slane %v375_v25, 2  ;;  %v383_v34 = vrot.slane %v382_v26, 2  ;;  %v390_v35 = vrot.slane %v389_v27, 2  ;;  %v329_v36 = vadd.f32 %v328_v28, %v327_v22  ;;  %v321_v13 = vld [vmem:[%s1162_s11] sm:$0xf]  ;;  %p807_p11 = pnand %p806_p8, %p1326_p0 }
  0x6b   : > { %v397_v37 = vrot.slane %v396_v29, 2  ;;  %v336_v38 = vadd.f32 %v335_v30, %v334_v23  ;;  %v343_v39 = vadd.f32 %v342_v31, %v341_v24  ;;  %v349_v40 = vrot.slane %v348_v32, 4 }
  0x6c   : > { %v377_v41 = vadd.f32 %v376_v33, %v375_v25  ;;  %v384_v42 = vadd.f32 %v383_v34, %v382_v26  ;;  %v391_v43 = vadd.f32 %v390_v35, %v389_v27  ;;  %v330_v44 = vrot.slane %v329_v36, 2  ;;  %p808_p4 = pneg %p807_p11 }
  0x6d   : > { %v398_v45 = vadd.f32 %v397_v37, %v396_v29  ;;  %v337_v46 = vrot.slane %v336_v38, 2  ;;  %v344_v47 = vrot.slane %v343_v39, 2  ;;  %v350_v48 = vadd.f32 %v349_v40, %v348_v32 }
  0x6e   : > { %v378_v49 = vrot.slane %v377_v41, 1  ;;  %v385_v50 = vrot.slane %v384_v42, 1  ;;  %v392_v51 = vrot.slane %v391_v43, 1  ;;  %v331_v52 = vadd.f32 %v330_v44, %v329_v36 }
  0x6f   : > { %v399_v53 = vrot.slane %v398_v45, 1  ;;  %v338_v54 = vadd.f32 %v337_v46, %v336_v38  ;;  %v345_v55 = vadd.f32 %v344_v47, %v343_v39  ;;  %v351_v56 = vrot.slane %v350_v48, 2 }
  0x70   : > { %v379_v57 = vadd.f32 %v378_v49, %v377_v41  ;;  %v386_v58 = vadd.f32 %v385_v50, %v384_v42  ;;  %v393_v59 = vadd.f32 %v392_v51, %v391_v43  ;;  %v332_v60 = vrot.slane %v331_v52, 1 }
  0x71   : > { %v400_v61 = vadd.f32 %v399_v53, %v398_v45  ;;  %v339_v62 = vrot.slane %v338_v54, 1  ;;  %v346_v63 = vrot.slane %v345_v55, 1  ;;  %v352_v0 = vadd.f32 %v351_v56, %v350_v48 }
  0x72   : > { %v405_v2 = vsel %vm359_vm1, %v386_v58, %v379_v57  ;;  %v333_v3 = vadd.f32 %v332_v60, %v331_v52  ;;  %v412_v4 = vmul.f32 %v1165_v8, %v1165_v8 }
  0x73   : > { %v406_v5 = vsel %vm361_vm2, %v393_v59, %v405_v2  ;;  %v340_v6 = vadd.f32 %v339_v62, %v338_v54  ;;  %v347_v7 = vadd.f32 %v346_v63, %v345_v55  ;;  %v353_v9 = vrot.slane %v352_v0, 1 }
  0x74   : > { %v407_v10 = vsel %vm363_vm3, %v400_v61, %v406_v5  ;;  %v413_v11 = vsel %vm326_vm0, %v412_v4, 0.0 }
  0x75   : > { %v409_v12 = vadd.f32 %v407_v10, %v368_v1  ;;  %v354_v14 = vadd.f32 %v353_v9, %v352_v0  ;;  %v360_v15 = vsel %vm359_vm1, %v340_v6, %v333_v3  ;;  %v414_v8 = vrot.slane %v413_v11, 4 }
  0x76   : > { %v362_v16 = vsel %vm361_vm2, %v347_v7, %v360_v15 }
  0x77   : > { %410 = vst [vmem:[%s1159_s8] sm:$0xf] %v409_v12  ;;  %v364_v17 = vsel %vm363_vm3, %v354_v14, %v362_v16  ;;  %v415_v18 = vadd.f32 %v414_v8, %v413_v11  ;;  %s809_s8 = sshll.u32 %s958_s6, 4  ;;  %s810_s8 = int_to_ptr.vmem [resolvable:$false] %s809_s8 }
  0x78   : > { %v366_v19 = vadd.f32 %v364_v17, %v321_v13  ;;  %s811_s7 = scalar_lea.vmem %s810_s8, 128  ;;  %p812_p7 = scmp.lt.s32.totalorder %s1197_s5, %s810_s8 }
  0x79   : > { %p813_p10 = scmp.lt.s32.totalorder %s811_s7, %s805_s9 }
  0x7b   : > { %p814_p12 = por %p813_p10, %p812_p7 }
  0x7d   : > { %p815_p9 = pnand %p814_p12, %p808_p4 }
  0x7f   : > { %818 = shalt.err (!%p815_p9)
}
  0x80   : > { %s819_s27 = scalar_lea.hbm %s1195_s14, 64  ;;  %s823_s24 = scalar_lea.hbm %s1310_s3, 128 }
  0x81   : > { %p820_p1 = scmp.ne.s32.totalorder %s1195_s14, %s819_s27  ;;  %p824_p5 = scmp.lt.u32.totalorder %s1195_s14, %s1310_s3 }
  0x82   : > { %p825_p13 = scmp.lt.u32.totalorder %s823_s24, %s819_s27  ;;  %p827_p8 = scmp.lt.u32.totalorder %s819_s27, %s1195_s14 }
  0x83   : > { %p821_p6 = pnand %p820_p1, %p1326_p0 }
  0x84   : > { %p826_p3 = por %p825_p13, %p824_p5 }
  0x85   : > { %p822_p2 = pneg %p821_p6 }
  0x86   : > { %p828_p11 = por %p827_p8, %p826_p3 }
  0x88   : > { %p829_p4 = pnand %p828_p11, %p822_p2 }
  0x8a   : > { %832 = shalt.err (!%p829_p4)
}
  0x8b   : > { %670 = dma.vmem_to_hbm [thread:$0]  (%p1326_p0), %s1197_s5, 64, %s1195_s14, %s1209_s13   ;;  %v416_v20 = vrot.slane %v415_v18, 2  ;;  %367 = vst [vmem:[%s1162_s11] sm:$0xf] %v366_v19 }
  0x8c   : > { %s423_s9 = scalar_lea.sflag [#allocation4], %s1140_s12  ;;  %s833_s8 = scalar_lea.vmem %s1207_s21, 64 }
  0x8d   : > { %v417_v21 = vadd.f32 %v416_v20, %v415_v18  ;;  %p834_p7 = scmp.ne.s32.totalorder %s1207_s21, %s833_s8  ;;  %s959_s7 = smov [#allocation7]  }
  0x8e   : > { %s837_s27 = sshll.u32 %s959_s7, 4  ;;  %s838_s27 = int_to_ptr.vmem [resolvable:$false] %s837_s27 }
  0x8f   : > { %p835_p10 = pnand %p834_p7, %p1326_p0  ;;  %s839_s22 = scalar_lea.vmem %s838_s27, 128 }
  0x90   : > { %p840_p9 = scmp.lt.s32.totalorder %s1207_s21, %s838_s27  ;;  %p841_p1 = scmp.lt.s32.totalorder %s839_s22, %s833_s8 }
  0x91   : > { %p836_p12 = pneg %p835_p10 }
  0x92   : > { %p842_p6 = por %p841_p1, %p840_p9 }
  0x94   : > { %p843_p2 = pnand %p842_p6, %p836_p12 }
  0x96   : > { %846 = shalt.err (!%p843_p2)
}
  0x97   : > { %s847_s12 = scalar_lea.hbm %s1205_s0, 64  ;;  %s851_s14 = scalar_lea.hbm %s1309_s2, 128 }
  0x98   : > { %p848_p5 = scmp.ne.s32.totalorder %s1205_s0, %s847_s12  ;;  %p852_p8 = scmp.lt.u32.totalorder %s1205_s0, %s1309_s2 }
  0x99   : > { %p853_p11 = scmp.lt.u32.totalorder %s851_s14, %s847_s12  ;;  %p855_p7 = scmp.lt.u32.totalorder %s847_s12, %s1205_s0 }
  0x9a   : > { %p849_p13 = pnand %p848_p5, %p1326_p0 }
  0x9b   : > { %p854_p4 = por %p853_p11, %p852_p8 }
  0x9c   : > { %p850_p3 = pneg %p849_p13 }
  0x9d   : > { %p856_p10 = por %p855_p7, %p854_p4 }
  0x9f   : > { %p857_p12 = pnand %p856_p10, %p850_p3 }
  0xa1   : > { %860 = shalt.err (!%p857_p12)
}
  0xa2   : > { %669 = dma.vmem_to_hbm [thread:$0]  (%p1326_p0), %s1207_s21, 64, %s1205_s0, %s423_s9   ;;  %v418_v22 = vrot.slane %v417_v21, 1  ;;  %v411_v23 = vld [vmem:[%s1156_s10] sm:$0x1] }
  0xa3   : > { %s474_s25 = sshll.u32 %s1156_s10, 4  ;;  %s661_s6 = sshll.u32 %s943_s18, 4  ;;  %s1259_s25 = int_to_ptr.vmem [resolvable:$true] %s474_s25 }
  0xa4   : > { %v419_v24 = vadd.f32 %v418_v22, %v417_v21  ;;  %s472_s27 = scalar_lea.hbm %s1311_s4, %s661_s6  ;;  %s861_s22 = scalar_lea.vmem %s1259_s25, 16 }
  0xa5   : > { %p862_p9 = scmp.ne.s32.totalorder %s1259_s25, %s861_s22  ;;  %s960_s21 = smov [#allocation10]  }
  0xa6   : > { %v420_v25 = vadd.f32 %v419_v24, %v411_v23  ;;  %s865_s0 = sshll.u32 %s960_s21, 4  ;;  %s866_s0 = int_to_ptr.vmem [resolvable:$false] %s865_s0 }
  0xa7   : > { %p863_p1 = pnand %p862_p9, %p1326_p0  ;;  %s867_s18 = scalar_lea.vmem %s866_s0, 32 }
  0xa8   : > { %421 = vst [vmem:[%s1156_s10] sm:$0x1] %v420_v25  ;;  %p868_p2 = scmp.lt.s32.totalorder %s1259_s25, %s866_s0  ;;  %p869_p5 = scmp.lt.s32.totalorder %s867_s18, %s861_s22 }
  0xa9   : > { %p864_p6 = pneg %p863_p1 }
  0xaa   : > { %p870_p13 = por %p869_p5, %p868_p2 }
  0xac   : > { %p871_p3 = pnand %p870_p13, %p864_p6 }
  0xae   : > { %874 = shalt.err (!%p871_p3)
}
  0xaf   : > { %s875_s9 = scalar_lea.hbm %s472_s27, 16  ;;  %s879_s11 = scalar_lea.hbm %s1311_s4, 32 }
  0xb0   : > { %p876_p8 = scmp.ne.s32.totalorder %s472_s27, %s875_s9  ;;  %p880_p7 = scmp.lt.u32.totalorder %s472_s27, %s1311_s4 }
  0xb1   : > { %p881_p10 = scmp.lt.u32.totalorder %s879_s11, %s875_s9  ;;  %p883_p9 = scmp.lt.u32.totalorder %s875_s9, %s472_s27 }
  0xb2   : > { %p877_p11 = pnand %p876_p8, %p1326_p0 }
  0xb3   : > { %p882_p12 = por %p881_p10, %p880_p7 }
  0xb4   : > { %p878_p4 = pneg %p877_p11 }
  0xb5   : > { %p884_p1 = por %p883_p9, %p882_p12 }
  0xb7   : > { %p885_p6 = pnand %p884_p1, %p878_p4 }
  0xb9   : > { %888 = shalt.err (!%p885_p6)
}
  0xba   : > { %671 = dma.vmem_to_hbm [thread:$0]  (%p1326_p0), %s1259_s25, 16, %s472_s27, %s1209_s13  }
  0xbb PF: > { %s486_s26 = sand.u32 1, %s931_s15   ;;  %p1327_p2 = scmp.ne.s32.totalorder %s1319_s30, 0 }
  0xbc   : > { %p1328_p5 = scmp.ge.s32.totalorder %s951_s20, 2  ;;  %s487_s24 = scalar_lea.sflag [#allocation4], %s486_s26 }
  0xbe   : > { %p683_p13 = pnand %p1328_p5, %p1327_p2 }
  0xc0   : > { %922 = dma.done.wait (!%p683_p13), %s487_s24, 64  }
  0xc1   : > { %924 = vsyncadd (!%p683_p13), %s487_s24, 4294967232  ;;  %s1329_s6 = sadd.s32 4294967294, %s951_s20  }
  0xc2   : > { %s495_s8 = sand.u32 1, %s1329_s6  }
  0xc3   : > { %s496_s7 = scalar_lea.sflag [#allocation9], %s495_s8 }
  0xc4   : > { %926 = dma.done.wait (!%p683_p13), %s496_s7, 80  }
  0xc5   : > { %928 = vsyncadd (!%p683_p13), %s496_s7, 4294967216  ;;  %s27_s20 = sadd.s32 1, %s951_s20   ;;  %s1330_s15 = smov %s935_s16 }
  0xc6   : > { %p24_p0 = scmp.ge.s32.totalorder %s27_s20, 4   ;;  %s1331_s16 = smov %s939_s17 }
  0xc7   : > { %s1332_s17 = smov %s1048_s29  ;;  %s1333_s18 = smov %s947_s19 }
  0xc8   : > { %s1334_s19 = smov %s1336_s23  ;;  %26 = sbr.rel (!%p24_p0) target bundleno = 12 (0xc), region = 122 }
  0xcf   :  { %509 = vsyncpa [#allocation3], 1 }
  0xd0   :  { %511 = vsyncpa [#allocation3 + $0x1], 1 }
  0xd1   :  { %512 = vsyncpa [#allocation6], 1 }
  0xd2   :  { %514 = vsyncpa [#allocation6 + $0x1], 1 }
  0xd3   :  { %515 = vsyncpa [#allocation4], 1 }
  0xd4   :  { %517 = vsyncpa [#allocation4 + $0x1], 1 }
  0xd5   :  { %518 = vsyncpa [#allocation9], 1 }
  0xd6   :  { %520 = vsyncpa [#allocation9 + $0x1], 1 }

</bundles_post_ra>
